<compile_context>
chip_gen: v5e
topology: v5e:2x2
jax: 0.10.0
libtpu: 0.0.40
codegen_flags: <defaults>
</compile_context>

<pallas_src>
import jax
import jax.numpy as jnp
from jax.experimental import pallas as pl
from jax.experimental.pallas import tpu as pltpu

_LANE = 128          # vector-lane width (last dim must map to 128 lanes)
_MAX_TILE_ROWS = 1024  # f32 rows per tile; 2 bufs in + 2 out ~= 2 MiB VMEM


def _round_up(x: int, m: int) -> int:
    return ((x + m - 1) // m) * m


def _csigmoid_kernel(x_ref, o_ref):
    # Pure elementwise: sigmoid on the whole tile (EUP exp, VPU add/recip).
    o_ref[...] = jax.nn.sigmoid(x_ref[...])


def complex_sigmoid(z: jax.Array) -> jax.Array:
    """sigmoid(Re(z)) + 1j*sigmoid(Im(z)) as complex64, any input shape."""
    z = z.astype(jnp.complex64)
    orig_shape = z.shape
    total = z.size

    # One fused XLA pass: split complex -> single stacked f32 vector.
    flat = jnp.concatenate(
        [jnp.real(z).reshape(-1), jnp.imag(z).reshape(-1)]
    )  # (2*total,) float32

    n = flat.size
    rows = pl.cdiv(n, _LANE)
    # Tile rows: full block for small inputs, capped tile for large inputs.
    tile_rows = min(_MAX_TILE_ROWS, _round_up(max(rows, 1), 8))
    padded_rows = _round_up(rows, tile_rows)
    padded_n = padded_rows * _LANE
    if padded_n != n:
        flat = jnp.pad(flat, (0, padded_n - n))
    slab = flat.reshape(padded_rows, _LANE)

    out_slab = pl.pallas_call(
        _csigmoid_kernel,
        out_shape=jax.ShapeDtypeStruct((padded_rows, _LANE), jnp.float32),
        grid=(padded_rows // tile_rows,),
        in_specs=[pl.BlockSpec((tile_rows, _LANE), lambda i: (i, 0))],
        out_specs=pl.BlockSpec((tile_rows, _LANE), lambda i: (i, 0)),
        compiler_params=pltpu.CompilerParams(
            dimension_semantics=("parallel",)
        ),
    )(slab)

    flat_out = out_slab.reshape(-1)[:n]
    re_out = flat_out[:total].reshape(orig_shape)
    im_out = flat_out[total:].reshape(orig_shape)
    return jax.lax.complex(re_out, im_out)


def _complex_sigmoid_ref(z: jax.Array) -> jax.Array:
    """Pure-JAX reference matching the PyTorch forward."""
    re = jax.nn.sigmoid(jnp.real(z))
    im = jax.nn.sigmoid(jnp.imag(z))
    return jax.lax.complex(re, im).astype(jnp.complex64)


if __name__ == "__main__":
    key = jax.random.PRNGKey(0)
    k_re, k_im = jax.random.split(key)
    B, C, H, W = 2, 4, 16, 16  # NCHW complex input
    re = jax.random.normal(k_re, (B, C, H, W), dtype=jnp.float32)
    im = jax.random.normal(k_im, (B, C, H, W), dtype=jnp.float32)
    z = jax.lax.complex(re, im)  # complex64

    out = complex_sigmoid(z)
    jax.block_until_ready(out)

    ref = _complex_sigmoid_ref(z)
    assert out.shape == z.shape
    assert out.dtype == jnp.complex64
    assert jnp.allclose(out, ref, atol=1e-6, rtol=1e-6)

    print("KERNEL_OK")
</pallas_src>

<mosaic_0001>
module attributes {stable_mosaic.version = 11 : i64} {
  func.func @_csigmoid_kernel(%arg0: i32, %arg1: memref<32x128xf32, #tpu.memory_space<vmem>>, %arg2: memref<32x128xf32, #tpu.memory_space<vmem>>) attributes {dimension_semantics = [#tpu.dimension_semantics<parallel>], iteration_bounds = array<i64: 1>, scalar_prefetch = 0 : i64, scratch_operands = 0 : i64, tpu.core_type = #tpu.core_type<tc>, window_params = [{transform_indices = @transform_0, window_bounds = array<i64: 32, 128>}, {transform_indices = @transform_1, window_bounds = array<i64: 32, 128>}]} {
    %c0 = arith.constant 0 : index
    %c0_0 = arith.constant 0 : index
    %0 = vector.load %arg1[%c0, %c0_0] : memref<32x128xf32, #tpu.memory_space<vmem>>, vector<32x128xf32>
    %1 = arith.negf %0 : vector<32x128xf32>
    %2 = math.exp %1 : vector<32x128xf32>
    %cst = arith.constant 1.000000e+00 : f32
    %3 = vector.broadcast %cst : f32 to vector<32x128xf32>
    %4 = arith.addf %3, %2 : vector<32x128xf32>
    %5 = arith.divf %3, %4 : vector<32x128xf32>
    %c0_1 = arith.constant 0 : index
    %c0_2 = arith.constant 0 : index
    %6 = vector.load %arg2[%c0_1, %c0_2] : memref<32x128xf32, #tpu.memory_space<vmem>>, vector<32x128xf32>
    tpu.vector_store %arg2[%c0_1, %c0_2], %5 {strides = array<i32>} : memref<32x128xf32, #tpu.memory_space<vmem>>, vector<32x128xf32>,
    return
  }
  func.func @transform_0(%arg0: i32) -> (i32, i32) {
    %c0_i32 = arith.constant 0 : i32
    %c0_i32_0 = arith.constant 0 : i32
    return %arg0, %c0_i32 : i32, i32
  }
  func.func @transform_1(%arg0: i32) -> (i32, i32) {
    %c0_i32 = arith.constant 0 : i32
    %c0_i32_0 = arith.constant 0 : i32
    return %arg0, %c0_i32 : i32, i32
  }
}

</mosaic_0001>

<bundles_post_ra>
// kernel: tpu_custom_call.1
= control target key start
LH: loop header
LB: loop body
LE: loop exit
PB: predicated region body
PF: predicated region fallthrough
CT: control target
= control target key end

     0   :  { %6 = vsyncpa [#allocation3], 0  ;;  %s264_s0 = inlined_call_operand.hbm [shape: f32[32,128], index: 0, kind: input, shape index: {}]   ;;  %s265_s1 = inlined_call_operand.hbm [shape: f32[32,128], index: 1, kind: output, shape index: {}]  }
   0x1   :  { %7 = vsyncpa [#allocation4], 0  ;;  %s12_s8 = sshll.u32 %s264_s0, 4  ;;  %s204_s9 = smov [#allocation2]   ;;  %s13_s8 = int_to_ptr.hbm [resolvable:$true] %s12_s8 }
   0x2   :  { %s14_s10 = sshll.u32 %s204_s9, 4  ;;  %s205_s11 = smov 128   ;;  %s15_s10 = int_to_ptr.vmem [resolvable:$true] %s14_s10 }
   0x3   :  { %s206_s12 = smov 8  }
   0x4   :  { %20 = dma.hbm_to_vmem [thread:$0]  %s13_s8, 512, %s15_s10, [#allocation3], %s205_s11, %s205_s11, %s206_s12  }
   0x5   :  { %200 = dma.done.wait [#allocation3], 512  }
   0x6   :  { %201 = vsyncadd [#allocation3], 4294966784  ;;  %v25_v0 = vld [vmem:[#allocation2] sm:$0xff]  ;;  %v26_v1 = vld [vmem:[#allocation2 + $0x8] sm:$0xff]  ;;  %s207_s0 = smov [#allocation5]   ;;  %s115_s16 = sshll.u32 %s265_s1, 4  ;;  %s116_s16 = int_to_ptr.hbm [resolvable:$true] %s115_s16 }
   0x7   :  { %v27_v2 = vld [vmem:[#allocation2 + $0x10] sm:$0xff]  ;;  %v128_v3 = vmul.f32 -1.442695, %v25_v0  ;;  %v129_v4 = vmul.f32 -1.442695, %v26_v1  ;;  %v28_v6 = vld [vmem:[#allocation2 + $0x18] sm:$0xff] }
   0x8   :  { %v130_v5 = vmul.f32 -1.442695, %v27_v2  ;;  %v131_v7 = vmul.f32 -1.442695, %v28_v6  ;;  %s113_s13 = sshll.u32 %s207_s0, 4  ;;  %s114_s13 = int_to_ptr.vmem [resolvable:$true] %s113_s13 }
   0x9   :  { %136 = vpow2.f32 %v128_v3 }
   0xa   :  { %138 = vpow2.f32 %v129_v4 }
   0xb   :  { %140 = vpow2.f32 %v130_v5 }
   0xc   :  { %142 = vpow2.f32 %v131_v7 }
   0xf   :  { %v137_v8 = vpop.eup %136 }
  0x10   :  { %v139_v9 = vpop.eup %138  ;;  %v41_v10 = vadd.f32 1.0, %v137_v8 }
  0x11   :  { %v141_v11 = vpop.eup %140  ;;  %v42_v12 = vadd.f32 1.0, %v139_v9 }
  0x12   :  { %v143_v13 = vpop.eup %142  ;;  %144 = vrcp.f32 %v41_v10  ;;  %v43_v14 = vadd.f32 1.0, %v141_v11  ;;  %v54_v16 = vand.u32 2147483647, %v41_v10  ;;  %v56_v17 = vand.u32 2147483648, %v41_v10 }
  0x13   :  { %146 = vrcp.f32 %v42_v12  ;;  %v44_v15 = vadd.f32 1.0, %v143_v13  ;;  %v69_v19 = vand.u32 2147483647, %v42_v12  ;;  %v71_v20 = vand.u32 2147483648, %v42_v12 }
  0x14   :  { %148 = vrcp.f32 %v43_v14  ;;  %vm50_vm0 = vweird.f32 %v41_v10  ;;  %vm65_vm1 = vweird.f32 %v42_v12  ;;  %vm224_vm3 = vcmp.eq.f32.partialorder %v54_v16, 8.507059e+37 }
  0x15   :  { %150 = vrcp.f32 %v44_v15  ;;  %v57_v26 = vor.u32 1.1754944e-38, %v56_v17  ;;  %vm228_vm5 = vcmp.eq.f32.partialorder %v69_v19, 8.507059e+37  ;;  %v72_v30 = vor.u32 1.1754944e-38, %v71_v20 }
  0x16   :  { %vm80_vm6 = vweird.f32 %v43_v14  ;;  %v84_v34 = vand.u32 2147483647, %v43_v14  ;;  %v86_v37 = vand.u32 2147483648, %v43_v14  ;;  %vm95_vm8 = vweird.f32 %v44_v15 }
  0x17   :  { %v101_v42 = vand.u32 2147483648, %v44_v15  ;;  %v99_v45 = vand.u32 2147483647, %v44_v15 }
  0x18   :  { %v145_v18 = vpop.eup %144  ;;  %v87_v51 = vor.u32 1.1754944e-38, %v86_v37  ;;  %vm85_vm13 = vcmp.eq.f32.partialorder %v84_v34, 8.507059e+37 }
  0x19   :  { %v147_v21 = vpop.eup %146  ;;  %v46_v22 = vmul.f32 %v145_v18, %v41_v10  ;;  %vm51_vm2 = vweird.f32 %v145_v18  ;;  %v102_v55 = vor.u32 1.1754944e-38, %v101_v42  ;;  %vm100_vm15 = vcmp.eq.f32.partialorder %v99_v45, 8.507059e+37 }
  0x1a   :  { %v61_v23 = vmul.f32 %v147_v21, %v42_v12  ;;  %v149_v27 = vpop.eup %148  ;;  %vm66_vm4 = vweird.f32 %v147_v21  ;;  %vm233_vm7 = vmor %vm50_vm0, %vm51_vm2 }
  0x1b   :  { %v47_v24 = vsub.f32 1.0, %v46_v22  ;;  %v151_v31 = vpop.eup %150  ;;  %v76_v33 = vmul.f32 %v149_v27, %v43_v14  ;;  %vm238_vm9 = vmor %vm65_vm1, %vm66_vm4  ;;  %vm81_vm10 = vweird.f32 %v149_v27 }
  0x1c   :  { %v62_v28 = vsub.f32 1.0, %v61_v23  ;;  %v91_v38 = vmul.f32 %v151_v31, %v44_v15  ;;  %vm96_vm11 = vweird.f32 %v151_v31  ;;  %vm249_vm12 = vmor %vm80_vm6, %vm81_vm10 }
  0x1d   :  { %v48_v32 = vmul.f32 %v145_v18, %v47_v24  ;;  %v77_v41 = vsub.f32 1.0, %v76_v33  ;;  %vm97_vm14 = vmor %vm95_vm8, %vm96_vm11 }
  0x1e   :  { %v63_v36 = vmul.f32 %v147_v21, %v62_v28  ;;  %v92_v44 = vsub.f32 1.0, %v91_v38 }
  0x1f   :  { %v49_v39 = vadd.f32 %v145_v18, %v48_v32  ;;  %v78_v47 = vmul.f32 %v149_v27, %v77_v41 }
  0x20   :  { %v64_v43 = vadd.f32 %v147_v21, %v63_v36  ;;  %v93_v52 = vmul.f32 %v151_v31, %v92_v44 }
  0x21   :  { %v53_v46 = vsel %vm233_vm7, %v145_v18, %v49_v39  ;;  %v79_v54 = vadd.f32 %v149_v27, %v78_v47 }
  0x22   :  { %v58_v48 = vsel %vm224_vm3, %v57_v26, %v53_v46  ;;  %v68_v49 = vsel %vm238_vm9, %v147_v21, %v64_v43  ;;  %v94_v56 = vadd.f32 %v151_v31, %v93_v52 }
  0x23   :  { %105 = vst [vmem:[#allocation5] sm:$0xff] %v58_v48  ;;  %v73_v53 = vsel %vm228_vm5, %v72_v30, %v68_v49  ;;  %v83_v57 = vsel %vm249_vm12, %v149_v27, %v79_v54 }
  0x24   :  { %106 = vst [vmem:[#allocation5 + $0x8] sm:$0xff] %v73_v53  ;;  %v88_v58 = vsel %vm85_vm13, %v87_v51, %v83_v57  ;;  %v98_v59 = vsel %vm97_vm14, %v151_v31, %v94_v56 }
  0x25   :  { %107 = vst [vmem:[#allocation5 + $0x10] sm:$0xff] %v88_v58  ;;  %v103_v60 = vsel %vm100_vm15, %v102_v55, %v98_v59 }
  0x26   :  { %108 = vst [vmem:[#allocation5 + $0x18] sm:$0xff] %v103_v60 }
  0x27   :  { %121 = dma.vmem_to_hbm [thread:$0]  %s114_s13, 512, %s116_s16, [#allocation4], %s205_s11, %s205_s11, %s206_s12  }
  0x28   :  { %202 = dma.done.wait [#allocation4], 512  }
  0x29   :  { %203 = vsyncadd [#allocation4], 4294966784 }
  0x2a   :  { %126 = vsyncpa [#allocation3], 1 }
  0x2b   :  { %127 = vsyncpa [#allocation4], 1 }

</bundles_post_ra>
